<compile_context>
chip_gen: v7x
topology: tpu7x:2x2x1
jax: 0.10.0
libtpu: 0.0.40
codegen_flags: <defaults>
</compile_context>

<pallas_src>
import numpy as np

import jax
import jax.numpy as jnp
from jax.experimental import pallas as pl
from jax.experimental.pallas import tpu as pltpu


# First layer uses VPU broadcast-FMAs (instead of the MXU) when the fan-in is
# at most this; a contraction depth of 3 uses ~2% of the MXU otherwise.
_VPU_FIRST_LAYER_MAX_FANIN = 16


def _round_up(v, m):
    return ((v + m - 1) // m) * m


# ---------------------------------------------------------------------------
# Host-side group construction (mirrors the PyTorch __init__ exactly).
# ---------------------------------------------------------------------------
def build_groups(binary_mat):
    n_x_o, n_x_b = binary_mat.shape
    full_input_condition = []
    for i in range(n_x_o):
        condition = 1
        for j in range(n_x_b):
            condition = condition * int(binary_mat[i, j])
        full_input_condition.append(condition)

    selected_state_idx_mat = []
    n_x_o_mat = []
    i = 0
    while i < n_x_o:
        if full_input_condition[i] == 0:
            selected = [j for j in range(n_x_b) if int(binary_mat[i, j]) == 1]
            selected_state_idx_mat.append(selected)
            n_x_o_mat.append(1)
        elif full_input_condition[i] == 1:
            counter = 1
            while i + counter < n_x_o and full_input_condition[i + counter] == 1:
                counter += 1
            selected_state_idx_mat.append(list(range(n_x_b)))
            n_x_o_mat.append(counter)
            i = i + counter - 1
        i += 1
    return selected_state_idx_mat, n_x_o_mat


# ---------------------------------------------------------------------------
# Host-side fusion of per-group subnets into one block-structured, padded MLP.
# ---------------------------------------------------------------------------
def fuse_params(groups_idx, group_sizes, params, n_x_b, n_feat,
                num_hidden_layers, *, compute_dtype=jnp.bfloat16,
                pad_hidden_to=None):
    G = len(groups_idx)
    H = G * n_feat
    n_x_o = int(sum(group_sizes))

    # 128/256-align the fused hidden width (lane-dense layout, full MXU tiles).
    if pad_hidden_to is None:
        pad_hidden_to = 256 if H >= 256 else 128
    Hp = _round_up(H, pad_hidden_to)
    # Pad the output width only when it is large enough to matter.
    n_x_o_p = _round_up(n_x_o, 128) if n_x_o >= 64 else n_x_o

    W1 = np.zeros((n_x_b, Hp), np.float32)
    b1 = np.zeros((1, Hp), np.float32)
    Wh = [np.zeros((Hp, Hp), np.float32) for _ in range(num_hidden_layers - 1)]
    bh = [np.zeros((1, Hp), np.float32) for _ in range(num_hidden_layers - 1)]
    W2 = np.zeros((Hp, n_x_o_p), np.float32)
    b2 = np.zeros((1, n_x_o_p), np.float32)

    off = 0
    for g, (idx, sz, p) in enumerate(zip(groups_idx, group_sizes, params)):
        c0, c1 = g * n_feat, (g + 1) * n_feat
        W1[np.asarray(idx, np.int64), c0:c1] = np.asarray(p["W1"], np.float32)
        b1[0, c0:c1] = np.asarray(p["b1"], np.float32)
        for l in range(num_hidden_layers - 1):
            Wh[l][c0:c1, c0:c1] = np.asarray(p["Wh"][l], np.float32)
            bh[l][0, c0:c1] = np.asarray(p["bh"][l], np.float32)
        W2[c0:c1, off:off + sz] = np.asarray(p["W2"], np.float32)
        b2[0, off:off + sz] = np.asarray(p["b2"], np.float32)
        off += sz

    # W1 stays f32 when the first layer runs on the VPU (it is tiny anyway);
    # MXU-bound weights go to the compute dtype (bf16 by default), biases stay f32.
    w1_dtype = (jnp.float32 if n_x_b <= _VPU_FIRST_LAYER_MAX_FANIN
                else compute_dtype)
    return {
        "W1": jnp.asarray(W1, dtype=w1_dtype),
        "b1": jnp.asarray(b1, dtype=jnp.float32),
        "Wh": [jnp.asarray(w, dtype=compute_dtype) for w in Wh],
        "bh": [jnp.asarray(b, dtype=jnp.float32) for b in bh],
        "W2": jnp.asarray(W2, dtype=compute_dtype),
        "b2": jnp.asarray(b2, dtype=jnp.float32),
        "n_x_o": n_x_o,
        "H": H,
    }


# ---------------------------------------------------------------------------
# Pallas kernel: fused MLP on one batch tile.
# ---------------------------------------------------------------------------
def _make_kernel(n_x_b, num_extra_hidden, use_vpu_first_layer):
    def kernel(x_ref, w1_ref, b1_ref, *rest):
        *hidden_refs, w2_ref, b2_ref, y_ref = rest

        x = x_ref[...].astype(jnp.float32)          # (tb, n_x_b)
        b1 = b1_ref[...]                            # (1, Hp) f32

        if use_vpu_first_layer:
            # Tiny contraction depth: unrolled broadcast-FMAs on the VPU instead
            # of a degenerate (mostly masked) MXU matmul.
            w1 = w1_ref[...].astype(jnp.float32)    # (n_x_b, Hp)
            acc = b1 + x[:, 0:1] * w1[0:1, :]
            for k in range(1, n_x_b):
                acc = acc + x[:, k:k + 1] * w1[k:k + 1, :]
            h = jnp.tanh(acc)                       # f32; tanh on the EUP
        else:
            h = jnp.tanh(
                jnp.dot(x.astype(w1_ref.dtype), w1_ref[...],
                        preferred_element_type=jnp.float32) + b1)

        for l in range(num_extra_hidden):
            wh_ref = hidden_refs[2 * l]
            bh_ref = hidden_refs[2 * l + 1]
            h = jnp.tanh(
                jnp.dot(h.astype(wh_ref.dtype), wh_ref[...],
                        preferred_element_type=jnp.float32) + bh_ref[...])

        y = jnp.dot(h.astype(w2_ref.dtype), w2_ref[...],
                    preferred_element_type=jnp.float32) + b2_ref[...]
        y_ref[...] = y.astype(y_ref.dtype)

    return kernel


# ---------------------------------------------------------------------------
# Wrapper: batch tiling, VMEM budgeting, pallas_call.
# ---------------------------------------------------------------------------
def fans_neural_output_update(x_b, fused, *, block_b=None,
                              single_buffer_weights=True):
    """y = forward(x_b) using the fused block-structured parameters."""
    B, n_x_b = x_b.shape
    n_x_o = fused["n_x_o"]
    Hp = fused["W1"].shape[1]
    n_x_o_p = fused["W2"].shape[1]
    num_extra = len(fused["Wh"])
    use_vpu_first = n_x_b <= _VPU_FIRST_LAYER_MAX_FANIN

    # ---- batch tiling: never run one giant block for large B ---------------
    if block_b is None:
        if B <= 256:
            block_b = B              # single resident tile for small problems
        elif B <= 2048:
            block_b = 256            # >= 2 grid steps => v7x megacore shards
        else:
            block_b = 512
    if block_b >= B:
        block_b = B                  # single block; shape == full array dims
    else:
        block_b = _round_up(block_b, 8)   # sublane alignment for tiled blocks
    B_pad = _round_up(B, block_b)
    x_in = jnp.pad(x_b, ((0, B_pad - B), (0, 0))) if B_pad != B else x_b
    grid = (B_pad // block_b,)

    weights = [fused["W1"], fused["b1"]]
    for wh, bh in zip(fused["Wh"], fused["bh"]):
        weights += [wh, bh]
    weights += [fused["W2"], fused["b2"]]
    inputs = [x_in] + weights

    # ---- VMEM budget (explicit; re-derived for v7x's 64 MiB) ---------------
    weight_bytes = sum(int(np.prod(a.shape)) * a.dtype.itemsize for a in weights)
    act_bytes = 4 * block_b * Hp * 4                     # h (f32) + casts, margin
    io_bytes = 2 * block_b * n_x_b * 4 + 2 * block_b * n_x_o_p * 4

    def _call(single_buffer):
        def _resident(arr):
            nd = arr.ndim
            kwargs = {}
            if single_buffer:
                # Loop-invariant weights: no point double-buffering them.
                kwargs["pipeline_mode"] = pl.Buffered(buffer_count=1)
            return pl.BlockSpec(tuple(arr.shape),
                                lambda i, _nd=nd: (0,) * _nd, **kwargs)

        in_specs = [pl.BlockSpec((block_b, n_x_b), lambda i: (i, 0))]
        in_specs += [_resident(a) for a in weights]
        out_spec = pl.BlockSpec((block_b, n_x_o_p), lambda i: (i, 0))

        est = weight_bytes * (1 if single_buffer else 2) + act_bytes + io_bytes
        vmem_limit = int(min(64 * 1024 * 1024, max(16 * 1024 * 1024, 2 * est)))

        return pl.pallas_call(
            _make_kernel(n_x_b, num_extra, use_vpu_first),
            out_shape=jax.ShapeDtypeStruct((B_pad, n_x_o_p), x_b.dtype),
            grid=grid,
            in_specs=in_specs,
            out_specs=out_spec,
            compiler_params=pltpu.CompilerParams(
                dimension_semantics=("parallel",),
                vmem_limit_bytes=vmem_limit),
        )(*inputs)

    if single_buffer_weights:
        try:
            y = _call(True)
        except Exception:
            # pipeline_mode=Buffered(1) unsupported in this jax build -> default
            # double-buffering (correctness identical, only VMEM residency differs).
            y = _call(False)
    else:
        y = _call(False)

    return y[:B, :n_x_o]


# ---------------------------------------------------------------------------
# Pure-JAX reference mirroring the PyTorch forward (per-group loop + gather).
# ---------------------------------------------------------------------------
def reference(x_b, groups_idx, params):
    outs = []
    for idx, p in zip(groups_idx, params):
        z = x_b[:, np.asarray(idx, np.int64)]
        h = jnp.tanh(z @ p["W1"] + p["b1"])
        for whl, bhl in zip(p["Wh"], p["bh"]):
            h = jnp.tanh(h @ whl + bhl)
        outs.append(h @ p["W2"] + p["b2"])
    return jnp.concatenate(outs, axis=1)


# ---------------------------------------------------------------------------
# Test
# ---------------------------------------------------------------------------
if __name__ == "__main__":
    key = jax.random.PRNGKey(0)

    B = 4
    n_x_b = 3          # augmented-state width (subnet inputs)
    n_x_o = 4          # number of outputs
    n_feat = 32
    num_hidden_layers = 2

    # Binary connectivity matrix: first two outputs fully connected (one shared
    # subnet of width 2), last two outputs each get a partial-input subnet.
    binary_mat = np.array(
        [[1, 1, 1],
         [1, 1, 1],
         [1, 0, 1],
         [0, 1, 1]], dtype=np.int32)

    groups_idx, group_sizes = build_groups(binary_mat)
    assert sum(group_sizes) == n_x_o

    # Per-group subnet parameters (weights stored as (in, out), bias (out,)).
    # The PyTorch init uses std=1e-8 weights; we use a larger scale so the
    # correctness check is non-trivial — forward semantics are init-independent.
    def draw(k, shape, scale=0.3):
        return (scale * jax.random.normal(k, shape)).astype(jnp.float32)

    params = []
    k = key
    for idx, sz in zip(groups_idx, group_sizes):
        n_sel = len(idx)
        k, k1, k2, k3, k4 = jax.random.split(k, 5)
        p = {
            "W1": draw(k1, (n_sel, n_feat)),
            "b1": draw(k2, (n_feat,), 0.1),
            "Wh": [],
            "bh": [],
        }
        for _ in range(num_hidden_layers - 1):
            k, kh1, kh2 = jax.random.split(k, 3)
            p["Wh"].append(draw(kh1, (n_feat, n_feat), 0.2))
            p["bh"].append(draw(kh2, (n_feat,), 0.1))
        p["W2"] = draw(k3, (n_feat, sz))
        p["b2"] = draw(k4, (sz,), 0.1)
        params.append(p)

    k, kx = jax.random.split(k)
    x_b = jax.random.normal(kx, (B, n_x_b)).astype(jnp.float32)
    y_ref = reference(x_b, groups_idx, params)

    # ---- f32 weights: tight correctness check ------------------------------
    fused_f32 = fuse_params(groups_idx, group_sizes, params, n_x_b, n_feat,
                            num_hidden_layers, compute_dtype=jnp.float32)
    y32 = jax.block_until_ready(fans_neural_output_update(x_b, fused_f32))
    assert y32.shape == (B, n_x_o)
    assert jnp.allclose(y32, y_ref, rtol=1e-4, atol=1e-4), (
        f"f32 max abs err = {float(jnp.max(jnp.abs(y32 - y_ref)))}")

    # ---- bf16 weights (default fast path, f32 accumulation) ----------------
    fused_bf16 = fuse_params(groups_idx, group_sizes, params, n_x_b, n_feat,
                             num_hidden_layers, compute_dtype=jnp.bfloat16)
    y16 = jax.block_until_ready(fans_neural_output_update(x_b, fused_bf16))
    assert y16.shape == (B, n_x_o)
    assert jnp.allclose(y16, y_ref, rtol=5e-2, atol=5e-2), (
        f"bf16 max abs err = {float(jnp.max(jnp.abs(y16 - y_ref)))}")

    # ---- multi-step grid with a non-divisible batch (padding path) ---------
    k, kx2 = jax.random.split(k)
    B2 = 272
    x2 = jax.random.normal(kx2, (B2, n_x_b)).astype(jnp.float32)
    y2 = jax.block_until_ready(
        fans_neural_output_update(x2, fused_f32, block_b=128))
    y2_ref = reference(x2, groups_idx, params)
    assert y2.shape == (B2, n_x_o)
    assert jnp.allclose(y2, y2_ref, rtol=1e-4, atol=1e-4), (
        f"tiled max abs err = {float(jnp.max(jnp.abs(y2 - y2_ref)))}")

    print("KERNEL_OK")
</pallas_src>

<mosaic_0001>
module attributes {stable_mosaic.version = 11 : i64} {
  func.func @kernel(%arg0: i32, %arg1: memref<4x3xf32, #tpu.memory_space<vmem>>, %arg2: memref<3x128xf32, #tpu.memory_space<vmem>>, %arg3: memref<1x128xf32, #tpu.memory_space<vmem>>, %arg4: memref<128x128xf32, #tpu.memory_space<vmem>>, %arg5: memref<1x128xf32, #tpu.memory_space<vmem>>, %arg6: memref<128x4xf32, #tpu.memory_space<vmem>>, %arg7: memref<1x4xf32, #tpu.memory_space<vmem>>, %arg8: memref<4x4xf32, #tpu.memory_space<vmem>>) attributes {dimension_semantics = [#tpu.dimension_semantics<parallel>], iteration_bounds = array<i64: 1>, scalar_prefetch = 0 : i64, scratch_operands = 0 : i64, tpu.core_type = #tpu.core_type<tc>, window_params = [{transform_indices = @transform_0, window_bounds = array<i64: 4, 3>}, {pipeline_mode = #tpu.pipeline_mode<synchronous>, transform_indices = @transform_1, window_bounds = array<i64: 3, 128>}, {pipeline_mode = #tpu.pipeline_mode<synchronous>, transform_indices = @transform_2, window_bounds = array<i64: 1, 128>}, {pipeline_mode = #tpu.pipeline_mode<synchronous>, transform_indices = @transform_3, window_bounds = array<i64: 128, 128>}, {pipeline_mode = #tpu.pipeline_mode<synchronous>, transform_indices = @transform_4, window_bounds = array<i64: 1, 128>}, {pipeline_mode = #tpu.pipeline_mode<synchronous>, transform_indices = @transform_5, window_bounds = array<i64: 128, 4>}, {pipeline_mode = #tpu.pipeline_mode<synchronous>, transform_indices = @transform_6, window_bounds = array<i64: 1, 4>}, {transform_indices = @transform_7, window_bounds = array<i64: 4, 4>}]} {
    %c0 = arith.constant 0 : index
    %c0_0 = arith.constant 0 : index
    %0 = vector.load %arg1[%c0, %c0_0] : memref<4x3xf32, #tpu.memory_space<vmem>>, vector<4x3xf32>
    %c0_1 = arith.constant 0 : index
    %c0_2 = arith.constant 0 : index
    %1 = vector.load %arg3[%c0_1, %c0_2] : memref<1x128xf32, #tpu.memory_space<vmem>>, vector<1x128xf32>
    %c0_3 = arith.constant 0 : index
    %c0_4 = arith.constant 0 : index
    %2 = vector.load %arg2[%c0_3, %c0_4] : memref<3x128xf32, #tpu.memory_space<vmem>>, vector<3x128xf32>
    %3 = vector.extract_strided_slice %0 {offsets = [0, 0], sizes = [4, 1], strides = [1, 1]} : vector<4x3xf32> to vector<4x1xf32>
    %4 = vector.extract_strided_slice %2 {offsets = [0, 0], sizes = [1, 128], strides = [1, 1]} : vector<3x128xf32> to vector<1x128xf32>
    %5 = vector.broadcast %3 : vector<4x1xf32> to vector<4x128xf32>
    %6 = vector.broadcast %4 : vector<1x128xf32> to vector<4x128xf32>
    %7 = arith.mulf %5, %6 : vector<4x128xf32>
    %8 = vector.broadcast %1 : vector<1x128xf32> to vector<4x128xf32>
    %9 = arith.addf %8, %7 : vector<4x128xf32>
    %10 = vector.extract_strided_slice %0 {offsets = [0, 1], sizes = [4, 1], strides = [1, 1]} : vector<4x3xf32> to vector<4x1xf32>
    %11 = vector.extract_strided_slice %2 {offsets = [1, 0], sizes = [1, 128], strides = [1, 1]} : vector<3x128xf32> to vector<1x128xf32>
    %12 = vector.broadcast %10 : vector<4x1xf32> to vector<4x128xf32>
    %13 = vector.broadcast %11 : vector<1x128xf32> to vector<4x128xf32>
    %14 = arith.mulf %12, %13 : vector<4x128xf32>
    %15 = arith.addf %9, %14 : vector<4x128xf32>
    %16 = vector.extract_strided_slice %0 {offsets = [0, 2], sizes = [4, 1], strides = [1, 1]} : vector<4x3xf32> to vector<4x1xf32>
    %17 = vector.extract_strided_slice %2 {offsets = [2, 0], sizes = [1, 128], strides = [1, 1]} : vector<3x128xf32> to vector<1x128xf32>
    %18 = vector.broadcast %16 : vector<4x1xf32> to vector<4x128xf32>
    %19 = vector.broadcast %17 : vector<1x128xf32> to vector<4x128xf32>
    %20 = arith.mulf %18, %19 : vector<4x128xf32>
    %21 = arith.addf %15, %20 : vector<4x128xf32>
    %22 = math.tanh %21 : vector<4x128xf32>
    %c0_5 = arith.constant 0 : index
    %c0_6 = arith.constant 0 : index
    %23 = vector.load %arg4[%c0_5, %c0_6] : memref<128x128xf32, #tpu.memory_space<vmem>>, vector<128x128xf32>
    %cst = arith.constant dense<0.000000e+00> : vector<4x128xf32>
    %24 = tpu.matmul %22, %23, %cst {dimension_numbers = #tpu.dot_dimension_numbers<[1], [0], [0], [1], [0, 0, 1, 1], [], []>} : vector<4x128xf32>, vector<128x128xf32>, vector<4x128xf32> -> vector<4x128xf32>
    %c0_7 = arith.constant 0 : index
    %c0_8 = arith.constant 0 : index
    %25 = vector.load %arg5[%c0_7, %c0_8] : memref<1x128xf32, #tpu.memory_space<vmem>>, vector<1x128xf32>
    %26 = vector.broadcast %25 : vector<1x128xf32> to vector<4x128xf32>
    %27 = arith.addf %24, %26 : vector<4x128xf32>
    %28 = math.tanh %27 : vector<4x128xf32>
    %c0_9 = arith.constant 0 : index
    %c0_10 = arith.constant 0 : index
    %29 = vector.load %arg6[%c0_9, %c0_10] : memref<128x4xf32, #tpu.memory_space<vmem>>, vector<128x4xf32>
    %cst_11 = arith.constant dense<0.000000e+00> : vector<4x4xf32>
    %30 = tpu.matmul %28, %29, %cst_11 {dimension_numbers = #tpu.dot_dimension_numbers<[1], [0], [0], [1], [0, 0, 1, 1], [], []>} : vector<4x128xf32>, vector<128x4xf32>, vector<4x4xf32> -> vector<4x4xf32>
    %c0_12 = arith.constant 0 : index
    %c0_13 = arith.constant 0 : index
    %31 = vector.load %arg7[%c0_12, %c0_13] : memref<1x4xf32, #tpu.memory_space<vmem>>, vector<1x4xf32>
    %32 = vector.broadcast %31 : vector<1x4xf32> to vector<4x4xf32>
    %33 = arith.addf %30, %32 : vector<4x4xf32>
    %c0_14 = arith.constant 0 : index
    %c0_15 = arith.constant 0 : index
    %34 = vector.load %arg8[%c0_14, %c0_15] : memref<4x4xf32, #tpu.memory_space<vmem>>, vector<4x4xf32>
    tpu.vector_store %arg8[%c0_14, %c0_15], %33 {strides = array<i32>} : memref<4x4xf32, #tpu.memory_space<vmem>>, vector<4x4xf32>,
    return
  }
  func.func @transform_0(%arg0: i32) -> (i32, i32) {
    %c0_i32 = arith.constant 0 : i32
    %c0_i32_0 = arith.constant 0 : i32
    return %arg0, %c0_i32 : i32, i32
  }
  func.func @transform_1(%arg0: i32) -> (i32, i32) {
    %c0_i32 = arith.constant 0 : i32
    %c0_i32_0 = arith.constant 0 : i32
    %c0_i32_1 = arith.constant 0 : i32
    return %c0_i32, %c0_i32_0 : i32, i32
  }
  func.func @transform_2(%arg0: i32) -> (i32, i32) {
    %c0_i32 = arith.constant 0 : i32
    %c0_i32_0 = arith.constant 0 : i32
    %c0_i32_1 = arith.constant 0 : i32
    return %c0_i32, %c0_i32_0 : i32, i32
  }
  func.func @transform_3(%arg0: i32) -> (i32, i32) {
    %c0_i32 = arith.constant 0 : i32
    %c0_i32_0 = arith.constant 0 : i32
    %c0_i32_1 = arith.constant 0 : i32
    return %c0_i32, %c0_i32_0 : i32, i32
  }
  func.func @transform_4(%arg0: i32) -> (i32, i32) {
    %c0_i32 = arith.constant 0 : i32
    %c0_i32_0 = arith.constant 0 : i32
    %c0_i32_1 = arith.constant 0 : i32
    return %c0_i32, %c0_i32_0 : i32, i32
  }
  func.func @transform_5(%arg0: i32) -> (i32, i32) {
    %c0_i32 = arith.constant 0 : i32
    %c0_i32_0 = arith.constant 0 : i32
    %c0_i32_1 = arith.constant 0 : i32
    return %c0_i32, %c0_i32_0 : i32, i32
  }
  func.func @transform_6(%arg0: i32) -> (i32, i32) {
    %c0_i32 = arith.constant 0 : i32
    %c0_i32_0 = arith.constant 0 : i32
    %c0_i32_1 = arith.constant 0 : i32
    return %c0_i32, %c0_i32_0 : i32, i32
  }
  func.func @transform_7(%arg0: i32) -> (i32, i32) {
    %c0_i32 = arith.constant 0 : i32
    %c0_i32_0 = arith.constant 0 : i32
    return %arg0, %c0_i32 : i32, i32
  }
}

module attributes {stable_mosaic.version = 11 : i64} {
  func.func @kernel(%arg0: i32, %arg1: memref<4x3xf32, #tpu.memory_space<vmem>>, %arg2: memref<3x128xf32, #tpu.memory_space<vmem>>, %arg3: memref<1x128xf32, #tpu.memory_space<vmem>>, %arg4: memref<128x128xf32, #tpu.memory_space<vmem>>, %arg5: memref<1x128xf32, #tpu.memory_space<vmem>>, %arg6: memref<128x4xf32, #tpu.memory_space<vmem>>, %arg7: memref<1x4xf32, #tpu.memory_space<vmem>>, %arg8: memref<4x4xf32, #tpu.memory_space<vmem>>) attributes {dimension_semantics = [#tpu.dimension_semantics<parallel>], iteration_bounds = array<i64: 1>, scalar_prefetch = 0 : i64, scratch_operands = 0 : i64, tpu.core_type = #tpu.core_type<tc>, window_params = [{transform_indices = @transform_0, window_bounds = array<i64: 4, 3>}, {pipeline_mode = #tpu.pipeline_mode<synchronous>, transform_indices = @transform_1, window_bounds = array<i64: 3, 128>}, {pipeline_mode = #tpu.pipeline_mode<synchronous>, transform_indices = @transform_2, window_bounds = array<i64: 1, 128>}, {pipeline_mode = #tpu.pipeline_mode<synchronous>, transform_indices = @transform_3, window_bounds = array<i64: 128, 128>}, {pipeline_mode = #tpu.pipeline_mode<synchronous>, transform_indices = @transform_4, window_bounds = array<i64: 1, 128>}, {pipeline_mode = #tpu.pipeline_mode<synchronous>, transform_indices = @transform_5, window_bounds = array<i64: 128, 4>}, {pipeline_mode = #tpu.pipeline_mode<synchronous>, transform_indices = @transform_6, window_bounds = array<i64: 1, 4>}, {transform_indices = @transform_7, window_bounds = array<i64: 4, 4>}]} {
    %c0 = arith.constant 0 : index
    %c0_0 = arith.constant 0 : index
    %0 = vector.load %arg1[%c0, %c0_0] : memref<4x3xf32, #tpu.memory_space<vmem>>, vector<4x3xf32>
    %c0_1 = arith.constant 0 : index
    %c0_2 = arith.constant 0 : index
    %1 = vector.load %arg3[%c0_1, %c0_2] : memref<1x128xf32, #tpu.memory_space<vmem>>, vector<1x128xf32>
    %c0_3 = arith.constant 0 : index
    %c0_4 = arith.constant 0 : index
    %2 = vector.load %arg2[%c0_3, %c0_4] : memref<3x128xf32, #tpu.memory_space<vmem>>, vector<3x128xf32>
    %3 = vector.extract_strided_slice %0 {offsets = [0, 0], sizes = [4, 1], strides = [1, 1]} : vector<4x3xf32> to vector<4x1xf32>
    %4 = vector.extract_strided_slice %2 {offsets = [0, 0], sizes = [1, 128], strides = [1, 1]} : vector<3x128xf32> to vector<1x128xf32>
    %5 = vector.broadcast %3 : vector<4x1xf32> to vector<4x128xf32>
    %6 = vector.broadcast %4 : vector<1x128xf32> to vector<4x128xf32>
    %7 = arith.mulf %5, %6 : vector<4x128xf32>
    %8 = vector.broadcast %1 : vector<1x128xf32> to vector<4x128xf32>
    %9 = arith.addf %8, %7 : vector<4x128xf32>
    %10 = vector.extract_strided_slice %0 {offsets = [0, 1], sizes = [4, 1], strides = [1, 1]} : vector<4x3xf32> to vector<4x1xf32>
    %11 = vector.extract_strided_slice %2 {offsets = [1, 0], sizes = [1, 128], strides = [1, 1]} : vector<3x128xf32> to vector<1x128xf32>
    %12 = vector.broadcast %10 : vector<4x1xf32> to vector<4x128xf32>
    %13 = vector.broadcast %11 : vector<1x128xf32> to vector<4x128xf32>
    %14 = arith.mulf %12, %13 : vector<4x128xf32>
    %15 = arith.addf %9, %14 : vector<4x128xf32>
    %16 = vector.extract_strided_slice %0 {offsets = [0, 2], sizes = [4, 1], strides = [1, 1]} : vector<4x3xf32> to vector<4x1xf32>
    %17 = vector.extract_strided_slice %2 {offsets = [2, 0], sizes = [1, 128], strides = [1, 1]} : vector<3x128xf32> to vector<1x128xf32>
    %18 = vector.broadcast %16 : vector<4x1xf32> to vector<4x128xf32>
    %19 = vector.broadcast %17 : vector<1x128xf32> to vector<4x128xf32>
    %20 = arith.mulf %18, %19 : vector<4x128xf32>
    %21 = arith.addf %15, %20 : vector<4x128xf32>
    %22 = math.tanh %21 : vector<4x128xf32>
    %c0_5 = arith.constant 0 : index
    %c0_6 = arith.constant 0 : index
    %23 = vector.load %arg4[%c0_5, %c0_6] : memref<128x128xf32, #tpu.memory_space<vmem>>, vector<128x128xf32>
    %cst = arith.constant dense<0.000000e+00> : vector<4x128xf32>
    %24 = tpu.matmul %22, %23, %cst {dimension_numbers = #tpu.dot_dimension_numbers<[1], [0], [0], [1], [0, 0, 1, 1], [], []>} : vector<4x128xf32>, vector<128x128xf32>, vector<4x128xf32> -> vector<4x128xf32>
    %c0_7 = arith.constant 0 : index
    %c0_8 = arith.constant 0 : index
    %25 = vector.load %arg5[%c0_7, %c0_8] : memref<1x128xf32, #tpu.memory_space<vmem>>, vector<1x128xf32>
    %26 = vector.broadcast %25 : vector<1x128xf32> to vector<4x128xf32>
    %27 = arith.addf %24, %26 : vector<4x128xf32>
    %28 = math.tanh %27 : vector<4x128xf32>
    %c0_9 = arith.constant 0 : index
    %c0_10 = arith.constant 0 : index
    %29 = vector.load %arg6[%c0_9, %c0_10] : memref<128x4xf32, #tpu.memory_space<vmem>>, vector<128x4xf32>
    %cst_11 = arith.constant dense<0.000000e+00> : vector<4x4xf32>
    %30 = tpu.matmul %28, %29, %cst_11 {dimension_numbers = #tpu.dot_dimension_numbers<[1], [0], [0], [1], [0, 0, 1, 1], [], []>} : vector<4x128xf32>, vector<128x4xf32>, vector<4x4xf32> -> vector<4x4xf32>
    %c0_12 = arith.constant 0 : index
    %c0_13 = arith.constant 0 : index
    %31 = vector.load %arg7[%c0_12, %c0_13] : memref<1x4xf32, #tpu.memory_space<vmem>>, vector<1x4xf32>
    %32 = vector.broadcast %31 : vector<1x4xf32> to vector<4x4xf32>
    %33 = arith.addf %30, %32 : vector<4x4xf32>
    %c0_14 = arith.constant 0 : index
    %c0_15 = arith.constant 0 : index
    %34 = vector.load %arg8[%c0_14, %c0_15] : memref<4x4xf32, #tpu.memory_space<vmem>>, vector<4x4xf32>
    tpu.vector_store %arg8[%c0_14, %c0_15], %33 {strides = array<i32>} : memref<4x4xf32, #tpu.memory_space<vmem>>, vector<4x4xf32>,
    return
  }
  func.func @transform_0(%arg0: i32) -> (i32, i32) {
    %c0_i32 = arith.constant 0 : i32
    %c0_i32_0 = arith.constant 0 : i32
    return %arg0, %c0_i32 : i32, i32
  }
  func.func @transform_1(%arg0: i32) -> (i32, i32) {
    %c0_i32 = arith.constant 0 : i32
    %c0_i32_0 = arith.constant 0 : i32
    %c0_i32_1 = arith.constant 0 : i32
    return %c0_i32, %c0_i32_0 : i32, i32
  }
  func.func @transform_2(%arg0: i32) -> (i32, i32) {
    %c0_i32 = arith.constant 0 : i32
    %c0_i32_0 = arith.constant 0 : i32
    %c0_i32_1 = arith.constant 0 : i32
    return %c0_i32, %c0_i32_0 : i32, i32
  }
  func.func @transform_3(%arg0: i32) -> (i32, i32) {
    %c0_i32 = arith.constant 0 : i32
    %c0_i32_0 = arith.constant 0 : i32
    %c0_i32_1 = arith.constant 0 : i32
    return %c0_i32, %c0_i32_0 : i32, i32
  }
  func.func @transform_4(%arg0: i32) -> (i32, i32) {
    %c0_i32 = arith.constant 0 : i32
    %c0_i32_0 = arith.constant 0 : i32
    %c0_i32_1 = arith.constant 0 : i32
    return %c0_i32, %c0_i32_0 : i32, i32
  }
  func.func @transform_5(%arg0: i32) -> (i32, i32) {
    %c0_i32 = arith.constant 0 : i32
    %c0_i32_0 = arith.constant 0 : i32
    %c0_i32_1 = arith.constant 0 : i32
    return %c0_i32, %c0_i32_0 : i32, i32
  }
  func.func @transform_6(%arg0: i32) -> (i32, i32) {
    %c0_i32 = arith.constant 0 : i32
    %c0_i32_0 = arith.constant 0 : i32
    %c0_i32_1 = arith.constant 0 : i32
    return %c0_i32, %c0_i32_0 : i32, i32
  }
  func.func @transform_7(%arg0: i32) -> (i32, i32) {
    %c0_i32 = arith.constant 0 : i32
    %c0_i32_0 = arith.constant 0 : i32
    return %arg0, %c0_i32 : i32, i32
  }
}

</mosaic_0001>

<bundles_post_ra>
// kernel: tpu_custom_call.1
= control target key start
LH: loop header
LB: loop body
LE: loop exit
PB: predicated region body
PF: predicated region fallthrough
CT: control target
= control target key end

     0   :  { %v465_v1 = vmov 0   ;;  %v466_v2 = vmov 2   ;;  %v467_v8 = vmov 0.0|0.0   ;;  %s651_s0 = inlined_call_operand.vmem [shape: f32[4,3], index: 0, kind: input, shape index: {}]   ;;  %s652_s1 = inlined_call_operand.vmem [shape: f32[3,128], index: 1, kind: input, shape index: {}]   ;;  %s653_s2 = inlined_call_operand.vmem [shape: f32[1,128], index: 2, kind: input, shape index: {}]   ;;  %s654_s3 = inlined_call_operand.vmem [shape: f32[128,128], index: 3, kind: input, shape index: {}]   ;;  %s655_s4 = inlined_call_operand.vmem [shape: f32[1,128], index: 4, kind: input, shape index: {}]   ;;  %s656_s5 = inlined_call_operand.vmem [shape: f32[128,4], index: 5, kind: input, shape index: {}]   ;;  %s657_s6 = inlined_call_operand.vmem [shape: f32[1,4], index: 6, kind: input, shape index: {}]   ;;  %s658_s7 = inlined_call_operand.hbm [shape: f32[4,4], index: 7, kind: output, shape index: {}]  }
   0x1   :  { %v27_v0 = vld [vmem:[%s651_s0] sm:$0xf]  ;;  %433 = vset.pattern.permute.xlu0 %v465_v1  ;;  %435 = vset.pattern.permute.xlu1 %v466_v2  ;;  %v69_v4 = vld [vmem:[%s654_s3 + $0x8] sm:$0xff]  ;;  %v70_v5 = vld [vmem:[%s654_s3 + $0x10] sm:$0xff] }
   0x2   :  { %v68_v3 = vld [vmem:[%s654_s3] sm:$0xff]  ;;  %32 = vperm.xlu0 %433, %v27_v0   ;;  %58 = vperm.xlu1 %435, %v27_v0   ;;  %v71_v7 = vld [vmem:[%s654_s3 + $0x18] sm:$0xff] }
   0x3   :  { %v379_v6 = vpack.c.bf16 %v69_v4, %v68_v3  ;;  %378 = vmatprep.subr.bf16.mxu0 %v467_v8  ;;  %402 = vmatprep.subr.bf16.mxu1 %v467_v8  ;;  %v382_v9 = vpack.c.bf16 %v71_v7, %v70_v5 }
   0x5   :  { %380 = vmatpush3.bf16.msra.mxu0 %v379_v6 }
   0x6   :  { %12 = vsyncpa [#allocation3], 0  ;;  %381 = vmatprep.subr.bf16.mxu0 %v467_v8  ;;  %v72_v10 = vld [vmem:[%s654_s3 + $0x20] sm:$0xff]  ;;  %v73_v11 = vld [vmem:[%s654_s3 + $0x28] sm:$0xff]  ;;  %v468_v12 = vmov 1   ;;  %vm469_vm0 = vmmov 0   ;;  %v35_v45 = vlaneseq }
   0x7   :  { %434 = vset.pattern.permute.xlu0 %v468_v12  ;;  %v385_v13 = vpack.c.bf16 %v73_v11, %v72_v10  ;;  %v74_v14 = vld [vmem:[%s654_s3 + $0x30] sm:$0xff]  ;;  %v75_v15 = vld [vmem:[%s654_s3 + $0x38] sm:$0xff]  ;;  %v76_v17 = vld [vmem:[%s654_s3 + $0x40] sm:$0xff]  ;;  %v470_v19 = vmov 0.0   ;;  %vm255_vm1 = vcmask 27648  }
   0x8   :  { %48 = vperm.xlu0 %434, %v27_v0   ;;  %v388_v16 = vpack.c.bf16 %v75_v15, %v74_v14  ;;  %v77_v18 = vld [vmem:[%s654_s3 + $0x48] sm:$0xff]  ;;  %340 = vmatprep.mubr.msk.f32.mxu0 %vm469_vm0, %v470_v19  ;;  %v78_v21 = vld [vmem:[%s654_s3 + $0x50] sm:$0xff]  ;;  %v79_v22 = vld [vmem:[%s654_s3 + $0x58] sm:$0xff]  ;;  %v36_v46 = vshrl.u32 %v35_v45, 7 }
   0x9   :  { %383 = vmatpush3.bf16.msra.mxu0 %v382_v9  ;;  %375 = vmatprep.mubr.msk.f32.mxu1 %vm469_vm0, %v470_v19  ;;  %v391_v20 = vpack.c.bf16 %v77_v18, %v76_v17  ;;  %v394_v23 = vpack.c.bf16 %v79_v22, %v78_v21  ;;  %v80_v24 = vld [vmem:[%s654_s3 + $0x60] sm:$0xff]  ;;  %v81_v25 = vld [vmem:[%s654_s3 + $0x68] sm:$0xff]  ;;  %v164_v29 = vld [vmem:[%s656_s5 + $0x10] sm:$0xff] }
   0xa   :  { %384 = vmatprep.subr.bf16.mxu0 %v467_v8  ;;  %v397_v26 = vpack.c.bf16 %v81_v25, %v80_v24  ;;  %v162_v27 = vld [vmem:[%s656_s5] sm:$0xff]  ;;  %v163_v28 = vld [vmem:[%s656_s5 + $0x8] sm:$0xff]  ;;  %v82_v30 = vld [vmem:[%s654_s3 + $0x70] sm:$0xff]  ;;  %v37_v47 = vsub.s32 0, %v36_v46  ;;  %v53_v50 = vsub.s32 1, %v36_v46  ;;  %v63_v51 = vsub.s32 2, %v36_v46 }
   0xb   :  { %v83_v31 = vld [vmem:[%s654_s3 + $0x78] sm:$0xff]  ;;  %v403_v32 = vpack.c.bf16 %v163_v28, %v162_v27  ;;  %v166_v36 = vld [vmem:[%s656_s5 + $0x20] sm:$0xff]  ;;  %v167_v37 = vld [vmem:[%s656_s5 + $0x28] sm:$0xff] }
   0xc   :  { %436 = vset.pattern.permute.xlu0 %v466_v2  ;;  %v165_v33 = vld [vmem:[%s656_s5 + $0x18] sm:$0xff]  ;;  %v400_v35 = vpack.c.bf16 %v83_v31, %v82_v30  ;;  %v409_v38 = vpack.c.bf16 %v167_v37, %v166_v36  ;;  %v168_v39 = vld [vmem:[%s656_s5 + $0x30] sm:$0xff]  ;;  %v170_v42 = vld [vmem:[%s656_s5 + $0x40] sm:$0xff] }
   0xd   :  { %386 = vmatpush3.bf16.msra.mxu0 %v385_v13  ;;  %404 = vmatpush3.bf16.msra.mxu1 %v403_v32  ;;  %v406_v34 = vpack.c.bf16 %v165_v33, %v164_v29  ;;  %v169_v40 = vld [vmem:[%s656_s5 + $0x38] sm:$0xff]  ;;  %v171_v43 = vld [vmem:[%s656_s5 + $0x48] sm:$0xff]  ;;  %v29_v48 = vld [vmem:[%s652_s1] sm:$0x7] }
   0xe   :  { %387 = vmatprep.subr.bf16.mxu0 %v467_v8  ;;  %405 = vmatprep.subr.bf16.mxu1 %v467_v8  ;;  %v412_v41 = vpack.c.bf16 %v169_v40, %v168_v39  ;;  %v415_v44 = vpack.c.bf16 %v171_v43, %v170_v42  ;;  %v38_v49 = vrot.slane %v29_v48, %v37_v47  ;;  %v271_v56 = vld [vmem:[%s653_s2] ss:$0 sm:$0xff]  ;;  %v172_v1 = vld [vmem:[%s656_s5 + $0x50] sm:$0xff]  ;;  %v173_v2 = vld [vmem:[%s656_s5 + $0x58] sm:$0xff] }
   0xf   :  { %v54_v54 = vrot.slane %v29_v48, %v53_v50  ;;  %v64_v55 = vrot.slane %v29_v48, %v63_v51  ;;  %v418_v3 = vpack.c.bf16 %v173_v2, %v172_v1  ;;  %v174_v4 = vld [vmem:[%s656_s5 + $0x60] sm:$0xff]  ;;  %v175_v5 = vld [vmem:[%s656_s5 + $0x68] sm:$0xff]  ;;  %v176_v7 = vld [vmem:[%s656_s5 + $0x70] sm:$0xff] }
  0x10   :  { %v421_v6 = vpack.c.bf16 %v175_v5, %v174_v4  ;;  %v177_v9 = vld [vmem:[%s656_s5 + $0x78] sm:$0xff]  ;;  %v272_v11 = vld [vmem:[%s655_s4] ss:$0 sm:$0xff]  ;;  %s471_s5 = smov [#allocation2]  }
  0x11   :  { %389 = vmatpush3.bf16.msra.mxu0 %v388_v16  ;;  %407 = vmatpush3.bf16.msra.mxu1 %v406_v34  ;;  %v424_v10 = vpack.c.bf16 %v177_v9, %v176_v7  ;;  %v273_v16 = vld [vmem:[%s657_s6] ss:$0 sm:$0xff]  ;;  %s263_s22 = sshll.u32 %s471_s5, 4  ;;  %s264_s22 = int_to_ptr.vmem [resolvable:$true] %s263_s22 }
  0x12   :  { %390 = vmatprep.subr.bf16.mxu0 %v467_v8  ;;  %408 = vmatprep.subr.bf16.mxu1 %v467_v8  ;;  %s441_s23 = scalar_lea.vmem %s264_s22, 64  ;;  %p446_p1 = scmp.lt.s32.totalorder %s264_s22, %s264_s22 }
  0x13   :  { %p442_p0 = scmp.ne.s32.totalorder %s264_s22, %s441_s23  ;;  %p447_p2 = scmp.lt.s32.totalorder %s441_s23, %s441_s23 }
  0x15   :  { %392 = vmatpush3.bf16.msra.mxu0 %v391_v20  ;;  %410 = vmatpush3.bf16.msra.mxu1 %v409_v38  ;;  %p448_p3 = por %p447_p2, %p446_p1 }
  0x16   :  { %393 = vmatprep.subr.bf16.mxu0 %v467_v8  ;;  %411 = vmatprep.subr.bf16.mxu1 %v467_v8 }
  0x17   :  { %p449_p4 = pnand %p448_p3, %p442_p0 }
  0x19   :  { %395 = vmatpush3.bf16.msra.mxu0 %v394_v23  ;;  %413 = vmatpush3.bf16.msra.mxu1 %v412_v41 }
  0x1a   :  { %396 = vmatprep.subr.bf16.mxu0 %v467_v8  ;;  %414 = vmatprep.subr.bf16.mxu1 %v467_v8 }
  0x1d   :  { %398 = vmatpush3.bf16.msra.mxu0 %v397_v26  ;;  %416 = vmatpush3.bf16.msra.mxu1 %v415_v44 }
  0x1e   :  { %399 = vmatprep.subr.bf16.mxu0 %v467_v8  ;;  %417 = vmatprep.subr.bf16.mxu1 %v467_v8 }
  0x21   :  { %401 = vmatpush3.bf16.msra.mxu0 %v400_v35  ;;  %419 = vmatpush3.bf16.msra.mxu1 %v418_v3 }
  0x22   :  { %420 = vmatprep.subr.bf16.mxu1 %v467_v8 }
  0x25   :  { %422 = vmatpush3.bf16.msra.mxu1 %v421_v6 }
  0x26   :  { %423 = vmatprep.subr.bf16.mxu1 %v467_v8 }
  0x29   :  { %425 = vmatpush3.bf16.msra.mxu1 %v424_v10 }
  0x81   :  { %v33_v52 = vpop.permute.xlu0 %32  ;;  %v59_v57 = vpop.permute.xlu1 %58 }
  0x82   :  { %v39_v53 = vmul.f32 %v38_v49, %v33_v52  ;;  %v65_v61 = vmul.f32 %v64_v55, %v59_v57 }
  0x84   :  { %v46_v59 = vadd.f32 %v271_v56, %v39_v53 }
  0x87   :  { %v49_v58 = vpop.permute.xlu0 %48 }
  0x88   :  { %v55_v60 = vmul.f32 %v54_v54, %v49_v58 }
  0x8a   :  { %v56_v62 = vadd.f32 %v55_v60, %v46_v59 }
  0x8c   :  { %v66_v63 = vadd.f32 %v65_v61, %v56_v62 }
  0x8e   :  { %437 = vtanh.f32 %v66_v63 }
  0x98   :  { %v438_v0 = vpop.eup %437 }
  0x99   :  { %341 = vmatmul.mubr.f32.vlgmr.msra.gmra.mrb[0].mxu0 %v438_v0 }
 0x16c   :  { %v157_v12 = vpop.f32.mrb[0].mxu0 }
 0x16d   :  { %v158_v13 = vadd.f32 %v272_v11, %v157_v12  ;;  %v342_v14 = vpop.f32.mrb[1].mxu0 }
 0x16f   :  { %439 = vtanh.f32 %v158_v13 }
 0x179   :  { %v440_v15 = vpop.eup %439 }
 0x17a   :  { %376 = vmatmul.mubr.f32.vlgmr.msra.gmra.mrb[0].mxu1 %v440_v15 }
 0x24d   :  { %v251_v17 = vpop.f32.mrb[0].mxu1 }
 0x24e   :  { %v252_v8 = vadd.f32 %v273_v16, %v251_v17  ;;  %v377_v18 = vpop.f32.mrb[1].mxu1 }
 0x250   :  { %256 = vst.msk [vmem:[#allocation2] sm:$0xf] %vm255_vm1, %v252_v8 }
 0x251   :  { %452 = shalt.err (!%p449_p4)
}
 0x252   :  { %s453_s25 = scalar_lea.hbm %s658_s7, 64 }
 0x253   :  { %p454_p5 = scmp.ne.s32.totalorder %s658_s7, %s453_s25  ;;  %p457_p6 = scmp.lt.u32.totalorder %s453_s25, %s658_s7 }
 0x255   :  { %p459_p7 = pnand %p457_p6, %p454_p5 }
 0x257   :  { %462 = shalt.err (!%p459_p7)
}
 0x258   :  { %266 = dma.vmem_to_hbm [thread:$0]  %s264_s22, 64, %s658_s7, [#allocation3]  }
 0x259   :  { %463 = dma.done.wait [#allocation3], 64  }
 0x25a   :  { %464 = vsyncadd [#allocation3], 4294967232 }
 0x25b   :  { %270 = vsyncpa [#allocation3], 1 }

// kernel: tpu_custom_call.1
= control target key start
LH: loop header
LB: loop body
LE: loop exit
PB: predicated region body
PF: predicated region fallthrough
CT: control target
= control target key end

     0   :  { %v465_v1 = vmov 0   ;;  %v466_v2 = vmov 2   ;;  %v467_v8 = vmov 0.0|0.0   ;;  %s651_s0 = inlined_call_operand.vmem [shape: f32[4,3], index: 0, kind: input, shape index: {}]   ;;  %s652_s1 = inlined_call_operand.vmem [shape: f32[3,128], index: 1, kind: input, shape index: {}]   ;;  %s653_s2 = inlined_call_operand.vmem [shape: f32[1,128], index: 2, kind: input, shape index: {}]   ;;  %s654_s3 = inlined_call_operand.vmem [shape: f32[128,128], index: 3, kind: input, shape index: {}]   ;;  %s655_s4 = inlined_call_operand.vmem [shape: f32[1,128], index: 4, kind: input, shape index: {}]   ;;  %s656_s5 = inlined_call_operand.vmem [shape: f32[128,4], index: 5, kind: input, shape index: {}]   ;;  %s657_s6 = inlined_call_operand.vmem [shape: f32[1,4], index: 6, kind: input, shape index: {}]   ;;  %s658_s7 = inlined_call_operand.hbm [shape: f32[4,4], index: 7, kind: output, shape index: {}]  }
   0x1   :  { %v27_v0 = vld [vmem:[%s651_s0] sm:$0xf]  ;;  %433 = vset.pattern.permute.xlu0 %v465_v1  ;;  %435 = vset.pattern.permute.xlu1 %v466_v2  ;;  %v69_v4 = vld [vmem:[%s654_s3 + $0x8] sm:$0xff]  ;;  %v70_v5 = vld [vmem:[%s654_s3 + $0x10] sm:$0xff] }
   0x2   :  { %v68_v3 = vld [vmem:[%s654_s3] sm:$0xff]  ;;  %32 = vperm.xlu0 %433, %v27_v0   ;;  %58 = vperm.xlu1 %435, %v27_v0   ;;  %v71_v7 = vld [vmem:[%s654_s3 + $0x18] sm:$0xff] }
   0x3   :  { %v379_v6 = vpack.c.bf16 %v69_v4, %v68_v3  ;;  %378 = vmatprep.subr.bf16.mxu0 %v467_v8  ;;  %402 = vmatprep.subr.bf16.mxu1 %v467_v8  ;;  %v382_v9 = vpack.c.bf16 %v71_v7, %v70_v5 }
   0x5   :  { %380 = vmatpush3.bf16.msra.mxu0 %v379_v6 }
   0x6   :  { %12 = vsyncpa [#allocation3], 0  ;;  %381 = vmatprep.subr.bf16.mxu0 %v467_v8  ;;  %v72_v10 = vld [vmem:[%s654_s3 + $0x20] sm:$0xff]  ;;  %v73_v11 = vld [vmem:[%s654_s3 + $0x28] sm:$0xff]  ;;  %v468_v12 = vmov 1   ;;  %vm469_vm0 = vmmov 0   ;;  %v35_v45 = vlaneseq }
   0x7   :  { %434 = vset.pattern.permute.xlu0 %v468_v12  ;;  %v385_v13 = vpack.c.bf16 %v73_v11, %v72_v10  ;;  %v74_v14 = vld [vmem:[%s654_s3 + $0x30] sm:$0xff]  ;;  %v75_v15 = vld [vmem:[%s654_s3 + $0x38] sm:$0xff]  ;;  %v76_v17 = vld [vmem:[%s654_s3 + $0x40] sm:$0xff]  ;;  %v470_v19 = vmov 0.0   ;;  %vm255_vm1 = vcmask 27648  }
   0x8   :  { %48 = vperm.xlu0 %434, %v27_v0   ;;  %v388_v16 = vpack.c.bf16 %v75_v15, %v74_v14  ;;  %v77_v18 = vld [vmem:[%s654_s3 + $0x48] sm:$0xff]  ;;  %340 = vmatprep.mubr.msk.f32.mxu0 %vm469_vm0, %v470_v19  ;;  %v78_v21 = vld [vmem:[%s654_s3 + $0x50] sm:$0xff]  ;;  %v79_v22 = vld [vmem:[%s654_s3 + $0x58] sm:$0xff]  ;;  %v36_v46 = vshrl.u32 %v35_v45, 7 }
   0x9   :  { %383 = vmatpush3.bf16.msra.mxu0 %v382_v9  ;;  %375 = vmatprep.mubr.msk.f32.mxu1 %vm469_vm0, %v470_v19  ;;  %v391_v20 = vpack.c.bf16 %v77_v18, %v76_v17  ;;  %v394_v23 = vpack.c.bf16 %v79_v22, %v78_v21  ;;  %v80_v24 = vld [vmem:[%s654_s3 + $0x60] sm:$0xff]  ;;  %v81_v25 = vld [vmem:[%s654_s3 + $0x68] sm:$0xff]  ;;  %v164_v29 = vld [vmem:[%s656_s5 + $0x10] sm:$0xff] }
   0xa   :  { %384 = vmatprep.subr.bf16.mxu0 %v467_v8  ;;  %v397_v26 = vpack.c.bf16 %v81_v25, %v80_v24  ;;  %v162_v27 = vld [vmem:[%s656_s5] sm:$0xff]  ;;  %v163_v28 = vld [vmem:[%s656_s5 + $0x8] sm:$0xff]  ;;  %v82_v30 = vld [vmem:[%s654_s3 + $0x70] sm:$0xff]  ;;  %v37_v47 = vsub.s32 0, %v36_v46  ;;  %v53_v50 = vsub.s32 1, %v36_v46  ;;  %v63_v51 = vsub.s32 2, %v36_v46 }
   0xb   :  { %v83_v31 = vld [vmem:[%s654_s3 + $0x78] sm:$0xff]  ;;  %v403_v32 = vpack.c.bf16 %v163_v28, %v162_v27  ;;  %v166_v36 = vld [vmem:[%s656_s5 + $0x20] sm:$0xff]  ;;  %v167_v37 = vld [vmem:[%s656_s5 + $0x28] sm:$0xff] }
   0xc   :  { %436 = vset.pattern.permute.xlu0 %v466_v2  ;;  %v165_v33 = vld [vmem:[%s656_s5 + $0x18] sm:$0xff]  ;;  %v400_v35 = vpack.c.bf16 %v83_v31, %v82_v30  ;;  %v409_v38 = vpack.c.bf16 %v167_v37, %v166_v36  ;;  %v168_v39 = vld [vmem:[%s656_s5 + $0x30] sm:$0xff]  ;;  %v170_v42 = vld [vmem:[%s656_s5 + $0x40] sm:$0xff] }
   0xd   :  { %386 = vmatpush3.bf16.msra.mxu0 %v385_v13  ;;  %404 = vmatpush3.bf16.msra.mxu1 %v403_v32  ;;  %v406_v34 = vpack.c.bf16 %v165_v33, %v164_v29  ;;  %v169_v40 = vld [vmem:[%s656_s5 + $0x38] sm:$0xff]  ;;  %v171_v43 = vld [vmem:[%s656_s5 + $0x48] sm:$0xff]  ;;  %v29_v48 = vld [vmem:[%s652_s1] sm:$0x7] }
   0xe   :  { %387 = vmatprep.subr.bf16.mxu0 %v467_v8  ;;  %405 = vmatprep.subr.bf16.mxu1 %v467_v8  ;;  %v412_v41 = vpack.c.bf16 %v169_v40, %v168_v39  ;;  %v415_v44 = vpack.c.bf16 %v171_v43, %v170_v42  ;;  %v38_v49 = vrot.slane %v29_v48, %v37_v47  ;;  %v271_v56 = vld [vmem:[%s653_s2] ss:$0 sm:$0xff]  ;;  %v172_v1 = vld [vmem:[%s656_s5 + $0x50] sm:$0xff]  ;;  %v173_v2 = vld [vmem:[%s656_s5 + $0x58] sm:$0xff] }
   0xf   :  { %v54_v54 = vrot.slane %v29_v48, %v53_v50  ;;  %v64_v55 = vrot.slane %v29_v48, %v63_v51  ;;  %v418_v3 = vpack.c.bf16 %v173_v2, %v172_v1  ;;  %v174_v4 = vld [vmem:[%s656_s5 + $0x60] sm:$0xff]  ;;  %v175_v5 = vld [vmem:[%s656_s5 + $0x68] sm:$0xff]  ;;  %v176_v7 = vld [vmem:[%s656_s5 + $0x70] sm:$0xff] }
  0x10   :  { %v421_v6 = vpack.c.bf16 %v175_v5, %v174_v4  ;;  %v177_v9 = vld [vmem:[%s656_s5 + $0x78] sm:$0xff]  ;;  %v272_v11 = vld [vmem:[%s655_s4] ss:$0 sm:$0xff]  ;;  %s471_s5 = smov [#allocation2]  }
  0x11   :  { %389 = vmatpush3.bf16.msra.mxu0 %v388_v16  ;;  %407 = vmatpush3.bf16.msra.mxu1 %v406_v34  ;;  %v424_v10 = vpack.c.bf16 %v177_v9, %v176_v7  ;;  %v273_v16 = vld [vmem:[%s657_s6] ss:$0 sm:$0xff]  ;;  %s263_s22 = sshll.u32 %s471_s5, 4  ;;  %s264_s22 = int_to_ptr.vmem [resolvable:$true] %s263_s22 }
  0x12   :  { %390 = vmatprep.subr.bf16.mxu0 %v467_v8  ;;  %408 = vmatprep.subr.bf16.mxu1 %v467_v8  ;;  %s441_s23 = scalar_lea.vmem %s264_s22, 64  ;;  %p446_p1 = scmp.lt.s32.totalorder %s264_s22, %s264_s22 }
  0x13   :  { %p442_p0 = scmp.ne.s32.totalorder %s264_s22, %s441_s23  ;;  %p447_p2 = scmp.lt.s32.totalorder %s441_s23, %s441_s23 }
  0x15   :  { %392 = vmatpush3.bf16.msra.mxu0 %v391_v20  ;;  %410 = vmatpush3.bf16.msra.mxu1 %v409_v38  ;;  %p448_p3 = por %p447_p2, %p446_p1 }
  0x16   :  { %393 = vmatprep.subr.bf16.mxu0 %v467_v8  ;;  %411 = vmatprep.subr.bf16.mxu1 %v467_v8 }
  0x17   :  { %p449_p4 = pnand %p448_p3, %p442_p0 }
  0x19   :  { %395 = vmatpush3.bf16.msra.mxu0 %v394_v23  ;;  %413 = vmatpush3.bf16.msra.mxu1 %v412_v41 }
  0x1a   :  { %396 = vmatprep.subr.bf16.mxu0 %v467_v8  ;;  %414 = vmatprep.subr.bf16.mxu1 %v467_v8 }
  0x1d   :  { %398 = vmatpush3.bf16.msra.mxu0 %v397_v26  ;;  %416 = vmatpush3.bf16.msra.mxu1 %v415_v44 }
  0x1e   :  { %399 = vmatprep.subr.bf16.mxu0 %v467_v8  ;;  %417 = vmatprep.subr.bf16.mxu1 %v467_v8 }
  0x21   :  { %401 = vmatpush3.bf16.msra.mxu0 %v400_v35  ;;  %419 = vmatpush3.bf16.msra.mxu1 %v418_v3 }
  0x22   :  { %420 = vmatprep.subr.bf16.mxu1 %v467_v8 }
  0x25   :  { %422 = vmatpush3.bf16.msra.mxu1 %v421_v6 }
  0x26   :  { %423 = vmatprep.subr.bf16.mxu1 %v467_v8 }
  0x29   :  { %425 = vmatpush3.bf16.msra.mxu1 %v424_v10 }
  0x81   :  { %v33_v52 = vpop.permute.xlu0 %32  ;;  %v59_v57 = vpop.permute.xlu1 %58 }
  0x82   :  { %v39_v53 = vmul.f32 %v38_v49, %v33_v52  ;;  %v65_v61 = vmul.f32 %v64_v55, %v59_v57 }
  0x84   :  { %v46_v59 = vadd.f32 %v271_v56, %v39_v53 }
  0x87   :  { %v49_v58 = vpop.permute.xlu0 %48 }
  0x88   :  { %v55_v60 = vmul.f32 %v54_v54, %v49_v58 }
  0x8a   :  { %v56_v62 = vadd.f32 %v55_v60, %v46_v59 }
  0x8c   :  { %v66_v63 = vadd.f32 %v65_v61, %v56_v62 }
  0x8e   :  { %437 = vtanh.f32 %v66_v63 }
  0x98   :  { %v438_v0 = vpop.eup %437 }
  0x99   :  { %341 = vmatmul.mubr.f32.vlgmr.msra.gmra.mrb[0].mxu0 %v438_v0 }
 0x16c   :  { %v157_v12 = vpop.f32.mrb[0].mxu0 }
 0x16d   :  { %v158_v13 = vadd.f32 %v272_v11, %v157_v12  ;;  %v342_v14 = vpop.f32.mrb[1].mxu0 }
 0x16f   :  { %439 = vtanh.f32 %v158_v13 }
 0x179   :  { %v440_v15 = vpop.eup %439 }
 0x17a   :  { %376 = vmatmul.mubr.f32.vlgmr.msra.gmra.mrb[0].mxu1 %v440_v15 }
 0x24d   :  { %v251_v17 = vpop.f32.mrb[0].mxu1 }
 0x24e   :  { %v252_v8 = vadd.f32 %v273_v16, %v251_v17  ;;  %v377_v18 = vpop.f32.mrb[1].mxu1 }
 0x250   :  { %256 = vst.msk [vmem:[#allocation2] sm:$0xf] %vm255_vm1, %v252_v8 }
 0x251   :  { %452 = shalt.err (!%p449_p4)
}
 0x252   :  { %s453_s25 = scalar_lea.hbm %s658_s7, 64 }
 0x253   :  { %p454_p5 = scmp.ne.s32.totalorder %s658_s7, %s453_s25  ;;  %p457_p6 = scmp.lt.u32.totalorder %s453_s25, %s658_s7 }
 0x255   :  { %p459_p7 = pnand %p457_p6, %p454_p5 }
 0x257   :  { %462 = shalt.err (!%p459_p7)
}
 0x258   :  { %266 = dma.vmem_to_hbm [thread:$0]  %s264_s22, 64, %s658_s7, [#allocation3]  }
 0x259   :  { %463 = dma.done.wait [#allocation3], 64  }
 0x25a   :  { %464 = vsyncadd [#allocation3], 4294967232 }
 0x25b   :  { %270 = vsyncpa [#allocation3], 1 }

</bundles_post_ra>
